<compile_context>
chip_gen: v7x
topology: tpu7x:2x2x1
jax: 0.10.0
libtpu: 0.0.40
codegen_flags: <defaults>
</compile_context>

<pallas_src>
import jax
import jax.numpy as jnp
from jax.experimental import pallas as pl
from jax.experimental.pallas import tpu as pltpu


def _round_up(x, m):
    return ((x + m - 1) // m) * m


def decoder_mlp_kernel(x_ref, w1_ref, b1_ref, w2_ref, b2_ref, w3_ref, b3_ref,
                       o_ref):
    """Transposed (lane-dense) 3-layer MLP tile.

    x_ref : [in_dim, TB] bf16   (batch in lanes)
    wN_ref: [out_f, in_f] bf16  (PyTorch weight layout, VMEM-resident)
    bN_ref: [out_f, 1] f32
    o_ref : [out_dim, TB] f32
    """
    x = x_ref[...]                                               # bf16 [in, TB]

    # Layer 1: [64, in] @ [in, TB] -> [64, TB], f32 acc; bias + tanh in f32.
    h1 = jnp.tanh(
        jnp.dot(w1_ref[...], x, preferred_element_type=jnp.float32)
        + b1_ref[...])

    # Layer 2: [64, 64] @ [64, TB] -> [64, TB]
    h2 = jnp.tanh(
        jnp.dot(w2_ref[...], h1.astype(jnp.bfloat16),
                preferred_element_type=jnp.float32)
        + b2_ref[...])

    # Layer 3: [2s, 64] @ [64, TB] -> [2s, TB]
    out = (jnp.dot(w3_ref[...], h2.astype(jnp.bfloat16),
                   preferred_element_type=jnp.float32)
           + b3_ref[...])
    o_ref[...] = out.astype(o_ref.dtype)


def decoder_forward(saz, params, *, max_tile=2048):
    """saz: [B, s_dim + a_dim + z_dim] float32. Returns [B, 2*s_dim] float32."""
    w1, b1, w2, b2, w3, b3 = params
    B, in_dim = saz.shape
    out_dim = w3.shape[0]

    # Batch tile: multiple of 128 lanes, capped at max_tile columns per step.
    TB = min(max_tile, _round_up(B, 128))
    grid = (pl.cdiv(B, TB),)
    B_pad = grid[0] * TB

    # Lane-dense layout: batch goes to the lane (last) dimension.  The cast to
    # bf16 fuses with the transpose in XLA and halves kernel input HBM traffic.
    x_t = jnp.transpose(saz).astype(jnp.bfloat16)                # [in_dim, B]
    if B_pad != B:
        x_t = jnp.pad(x_t, ((0, 0), (0, B_pad - B)))

    # One-shot bf16 weight cast (weights are VMEM-resident across grid steps).
    w1b = w1.astype(jnp.bfloat16)
    w2b = w2.astype(jnp.bfloat16)
    w3b = w3.astype(jnp.bfloat16)

    resident = lambda i: (0, 0)     # same block every step -> stays in VMEM

    out_t = pl.pallas_call(
        decoder_mlp_kernel,
        out_shape=jax.ShapeDtypeStruct((out_dim, B_pad), jnp.float32),
        grid_spec=pltpu.PrefetchScalarGridSpec(
            num_scalar_prefetch=0,
            grid=grid,
            in_specs=[
                pl.BlockSpec((in_dim, TB), lambda i: (0, i)),    # input tile
                pl.BlockSpec(w1.shape, resident),
                pl.BlockSpec(b1.shape, resident),
                pl.BlockSpec(w2.shape, resident),
                pl.BlockSpec(b2.shape, resident),
                pl.BlockSpec(w3.shape, resident),
                pl.BlockSpec(b3.shape, resident),
            ],
            out_specs=pl.BlockSpec((out_dim, TB), lambda i: (0, i)),
        ),
        compiler_params=pltpu.CompilerParams(
            dimension_semantics=("parallel",),   # v7x: shard steps over 2 TCs
        ),
    )(x_t, w1b, b1, w2b, b2, w3b, b3)

    return jnp.transpose(out_t[:, :B])


def init_decoder_params(key, s_dim, a_dim, z_dim, h_dim=64):
    """Deterministic init matching the PyTorch module's layer shapes.

    Weights are stored in PyTorch layout (out_features, in_features);
    biases as (out_features, 1) so they broadcast over the lane/batch dim."""
    in_dim = s_dim + a_dim + z_dim
    out_dim = 2 * s_dim
    k = jax.random.split(key, 6)

    def lin(kw, kb, fan_in, fan_out):
        # Uniform(-1/sqrt(fan_in), 1/sqrt(fan_in)) — same family as nn.Linear.
        bound = 1.0 / jnp.sqrt(jnp.float32(fan_in))
        w = jax.random.uniform(kw, (fan_out, fan_in), jnp.float32, -bound, bound)
        b = jax.random.uniform(kb, (fan_out, 1), jnp.float32, -bound, bound)
        return w, b

    w1, b1 = lin(k[0], k[1], in_dim, h_dim)
    w2, b2 = lin(k[2], k[3], h_dim, h_dim)
    w3, b3 = lin(k[4], k[5], h_dim, out_dim)
    return (w1, b1, w2, b2, w3, b3)


def decoder_reference(saz, params, mimic_bf16=False):
    """Pure-JAX reference in standard [batch, features] layout."""
    w1, b1, w2, b2, w3, b3 = params

    def linear(a, w, b):
        if mimic_bf16:
            a = a.astype(jnp.bfloat16)
            w = w.astype(jnp.bfloat16)
        return jnp.dot(a, w.T, preferred_element_type=jnp.float32) + b[:, 0]

    h1 = jnp.tanh(linear(saz, w1, b1))
    h2 = jnp.tanh(linear(h1, w2, b2))
    return linear(h2, w3, b3)


if __name__ == "__main__":
    s_dim, a_dim, z_dim = 8, 4, 4        # in_dim = 16, out_dim = 16
    key = jax.random.PRNGKey(0)
    k_params, k_x1, k_x2 = jax.random.split(key, 3)
    params = init_decoder_params(k_params, s_dim, a_dim, z_dim)

    fwd = jax.jit(decoder_forward)

    # Small demo batch (padded to a single 128-lane tile inside the wrapper).
    B = 8
    saz = jax.random.normal(k_x1, (B, s_dim + a_dim + z_dim), jnp.float32)
    out = jax.block_until_ready(fwd(saz, params))
    assert out.shape == (B, 2 * s_dim)
    ref_bf16 = decoder_reference(saz, params, mimic_bf16=True)
    ref_f32 = decoder_reference(saz, params, mimic_bf16=False)
    assert jnp.allclose(out, ref_bf16, atol=5e-3, rtol=5e-3)
    assert jnp.allclose(out, ref_f32, atol=5e-2, rtol=5e-2)

    # Larger, non-aligned batch: exercises multi-step grid, resident weights
    # and the padding/slicing path.
    B2 = 2500
    saz2 = jax.random.normal(k_x2, (B2, s_dim + a_dim + z_dim), jnp.float32)
    out2 = jax.block_until_ready(fwd(saz2, params))
    assert out2.shape == (B2, 2 * s_dim)
    ref2 = decoder_reference(saz2, params, mimic_bf16=True)
    assert jnp.allclose(out2, ref2, atol=5e-3, rtol=5e-3)

    print("KERNEL_OK")
</pallas_src>

<mosaic_0001>
module attributes {stable_mosaic.version = 11 : i64} {
  func.func @decoder_mlp_kernel(%arg0: i32, %arg1: memref<16x128xbf16, #tpu.memory_space<vmem>>, %arg2: memref<64x16xbf16, #tpu.memory_space<vmem>>, %arg3: memref<64x1xf32, #tpu.memory_space<vmem>>, %arg4: memref<64x64xbf16, #tpu.memory_space<vmem>>, %arg5: memref<64x1xf32, #tpu.memory_space<vmem>>, %arg6: memref<16x64xbf16, #tpu.memory_space<vmem>>, %arg7: memref<16x1xf32, #tpu.memory_space<vmem>>, %arg8: memref<16x128xf32, #tpu.memory_space<vmem>>) attributes {dimension_semantics = [#tpu.dimension_semantics<parallel>], iteration_bounds = array<i64: 1>, scalar_prefetch = 0 : i64, scratch_operands = 0 : i64, tpu.core_type = #tpu.core_type<tc>, window_params = [{transform_indices = @transform_0, window_bounds = array<i64: 16, 128>}, {pipeline_mode = #tpu.pipeline_mode<synchronous>, transform_indices = @transform_1, window_bounds = array<i64: 64, 16>}, {pipeline_mode = #tpu.pipeline_mode<synchronous>, transform_indices = @transform_2, window_bounds = array<i64: 64, 1>}, {pipeline_mode = #tpu.pipeline_mode<synchronous>, transform_indices = @transform_3, window_bounds = array<i64: 64, 64>}, {pipeline_mode = #tpu.pipeline_mode<synchronous>, transform_indices = @transform_4, window_bounds = array<i64: 64, 1>}, {pipeline_mode = #tpu.pipeline_mode<synchronous>, transform_indices = @transform_5, window_bounds = array<i64: 16, 64>}, {pipeline_mode = #tpu.pipeline_mode<synchronous>, transform_indices = @transform_6, window_bounds = array<i64: 16, 1>}, {transform_indices = @transform_7, window_bounds = array<i64: 16, 128>}]} {
    %c0 = arith.constant 0 : index
    %c0_0 = arith.constant 0 : index
    %0 = vector.load %arg1[%c0, %c0_0] : memref<16x128xbf16, #tpu.memory_space<vmem>>, vector<16x128xbf16>
    %c0_1 = arith.constant 0 : index
    %c0_2 = arith.constant 0 : index
    %1 = vector.load %arg2[%c0_1, %c0_2] : memref<64x16xbf16, #tpu.memory_space<vmem>>, vector<64x16xbf16>
    %cst = arith.constant dense<0.000000e+00> : vector<64x128xf32>
    %2 = tpu.matmul %1, %0, %cst {dimension_numbers = #tpu.dot_dimension_numbers<[1], [0], [0], [1], [0, 0, 1, 1], [], []>} : vector<64x16xbf16>, vector<16x128xbf16>, vector<64x128xf32> -> vector<64x128xf32>
    %c0_3 = arith.constant 0 : index
    %c0_4 = arith.constant 0 : index
    %3 = vector.load %arg3[%c0_3, %c0_4] : memref<64x1xf32, #tpu.memory_space<vmem>>, vector<64x1xf32>
    %4 = vector.broadcast %3 : vector<64x1xf32> to vector<64x128xf32>
    %5 = arith.addf %2, %4 : vector<64x128xf32>
    %6 = math.tanh %5 : vector<64x128xf32>
    %c0_5 = arith.constant 0 : index
    %c0_6 = arith.constant 0 : index
    %7 = vector.load %arg4[%c0_5, %c0_6] : memref<64x64xbf16, #tpu.memory_space<vmem>>, vector<64x64xbf16>
    %8 = arith.truncf %6 : vector<64x128xf32> to vector<64x128xbf16>
    %cst_7 = arith.constant dense<0.000000e+00> : vector<64x128xf32>
    %9 = tpu.matmul %7, %8, %cst_7 {dimension_numbers = #tpu.dot_dimension_numbers<[1], [0], [0], [1], [0, 0, 1, 1], [], []>} : vector<64x64xbf16>, vector<64x128xbf16>, vector<64x128xf32> -> vector<64x128xf32>
    %c0_8 = arith.constant 0 : index
    %c0_9 = arith.constant 0 : index
    %10 = vector.load %arg5[%c0_8, %c0_9] : memref<64x1xf32, #tpu.memory_space<vmem>>, vector<64x1xf32>
    %11 = vector.broadcast %10 : vector<64x1xf32> to vector<64x128xf32>
    %12 = arith.addf %9, %11 : vector<64x128xf32>
    %13 = math.tanh %12 : vector<64x128xf32>
    %c0_10 = arith.constant 0 : index
    %c0_11 = arith.constant 0 : index
    %14 = vector.load %arg6[%c0_10, %c0_11] : memref<16x64xbf16, #tpu.memory_space<vmem>>, vector<16x64xbf16>
    %15 = arith.truncf %13 : vector<64x128xf32> to vector<64x128xbf16>
    %cst_12 = arith.constant dense<0.000000e+00> : vector<16x128xf32>
    %16 = tpu.matmul %14, %15, %cst_12 {dimension_numbers = #tpu.dot_dimension_numbers<[1], [0], [0], [1], [0, 0, 1, 1], [], []>} : vector<16x64xbf16>, vector<64x128xbf16>, vector<16x128xf32> -> vector<16x128xf32>
    %c0_13 = arith.constant 0 : index
    %c0_14 = arith.constant 0 : index
    %17 = vector.load %arg7[%c0_13, %c0_14] : memref<16x1xf32, #tpu.memory_space<vmem>>, vector<16x1xf32>
    %18 = vector.broadcast %17 : vector<16x1xf32> to vector<16x128xf32>
    %19 = arith.addf %16, %18 : vector<16x128xf32>
    %c0_15 = arith.constant 0 : index
    %c0_16 = arith.constant 0 : index
    %20 = vector.load %arg8[%c0_15, %c0_16] : memref<16x128xf32, #tpu.memory_space<vmem>>, vector<16x128xf32>
    tpu.vector_store %arg8[%c0_15, %c0_16], %19 {strides = array<i32>} : memref<16x128xf32, #tpu.memory_space<vmem>>, vector<16x128xf32>,
    return
  }
  func.func @transform_0(%arg0: i32) -> (i32, i32) {
    %c0_i32 = arith.constant 0 : i32
    %c0_i32_0 = arith.constant 0 : i32
    return %c0_i32, %arg0 : i32, i32
  }
  func.func @transform_1(%arg0: i32) -> (i32, i32) {
    %c0_i32 = arith.constant 0 : i32
    %c0_i32_0 = arith.constant 0 : i32
    %c0_i32_1 = arith.constant 0 : i32
    return %c0_i32, %c0_i32_0 : i32, i32
  }
  func.func @transform_2(%arg0: i32) -> (i32, i32) {
    %c0_i32 = arith.constant 0 : i32
    %c0_i32_0 = arith.constant 0 : i32
    %c0_i32_1 = arith.constant 0 : i32
    return %c0_i32, %c0_i32_0 : i32, i32
  }
  func.func @transform_3(%arg0: i32) -> (i32, i32) {
    %c0_i32 = arith.constant 0 : i32
    %c0_i32_0 = arith.constant 0 : i32
    %c0_i32_1 = arith.constant 0 : i32
    return %c0_i32, %c0_i32_0 : i32, i32
  }
  func.func @transform_4(%arg0: i32) -> (i32, i32) {
    %c0_i32 = arith.constant 0 : i32
    %c0_i32_0 = arith.constant 0 : i32
    %c0_i32_1 = arith.constant 0 : i32
    return %c0_i32, %c0_i32_0 : i32, i32
  }
  func.func @transform_5(%arg0: i32) -> (i32, i32) {
    %c0_i32 = arith.constant 0 : i32
    %c0_i32_0 = arith.constant 0 : i32
    %c0_i32_1 = arith.constant 0 : i32
    return %c0_i32, %c0_i32_0 : i32, i32
  }
  func.func @transform_6(%arg0: i32) -> (i32, i32) {
    %c0_i32 = arith.constant 0 : i32
    %c0_i32_0 = arith.constant 0 : i32
    %c0_i32_1 = arith.constant 0 : i32
    return %c0_i32, %c0_i32_0 : i32, i32
  }
  func.func @transform_7(%arg0: i32) -> (i32, i32) {
    %c0_i32 = arith.constant 0 : i32
    %c0_i32_0 = arith.constant 0 : i32
    return %c0_i32, %arg0 : i32, i32
  }
}

</mosaic_0001>

<bundles_post_ra>
// kernel: decoder_forward.1
= control target key start
LH: loop header
LB: loop body
LE: loop exit
PB: predicated region body
PF: predicated region fallthrough
CT: control target
= control target key end

     0   :  { %vm111_vm0 = vcmask 130048   ;;  %v558_v1 = vmov 0   ;;  %vm277_vm1 = vcmask 523264   ;;  %vm560_vm2 = vmmov 0   ;;  %s700_s0 = inlined_call_operand.vmem [shape: bf16[16,128], index: 0, kind: input, shape index: {}]   ;;  %s701_s1 = inlined_call_operand.vmem [shape: bf16[64,16], index: 1, kind: input, shape index: {}]   ;;  %s702_s2 = inlined_call_operand.vmem [shape: f32[64,1], index: 2, kind: input, shape index: {}]   ;;  %s703_s4 = inlined_call_operand.vmem [shape: f32[64,1], index: 4, kind: input, shape index: {}]   ;;  %s704_s6 = inlined_call_operand.vmem [shape: f32[16,1], index: 6, kind: input, shape index: {}]   ;;  %s705_s3 = inlined_call_operand.vmem [shape: bf16[64,64], index: 3, kind: input, shape index: {}]   ;;  %s706_s5 = inlined_call_operand.vmem [shape: bf16[16,64], index: 5, kind: input, shape index: {}]   ;;  %s707_s7 = inlined_call_operand.vmem [shape: f32[16,128], index: 7, kind: output, shape index: {}]  }
   0x1   :  { %v516_v0 = vld [vmem:[%s700_s0] sm:$0xff]   ;;  %514 = vset.pattern.permute.xlu0 %v558_v1  ;;  %515 = vset.pattern.permute.xlu1 %v558_v1  ;;  %v518_v3 = vld [vmem:[%s701_s1 + $0x8] sm:$0xff]   ;;  %v519_v4 = vld [vmem:[%s701_s1 + $0x10] sm:$0xff]  }
   0x2   :  { %v517_v2 = vld [vmem:[%s701_s1] sm:$0xff]   ;;  %473 = vmatprep.subr.bf16.mxu0 %v516_v0  ;;  %v39_v6 = vld [vmem:[%s702_s2 + $0x10] sm:$0xff]  ;;  %v38_v7 = vld [vmem:[%s702_s2 + $0x8] sm:$0xff] }
   0x3   :  { %474 = vmatpush3.bf16.msra.mxu0 %v516_v0  ;;  %475 = vmatprep.mubr.msk.bf16.mxu0 %vm111_vm0, %v517_v2  ;;  %v37_v5 = vld [vmem:[%s702_s2] sm:$0xff]  ;;  %v40_v8 = vld [vmem:[%s702_s2 + $0x18] sm:$0xff]  ;;  %v42_v11 = vld [vmem:[%s702_s2 + $0x28] sm:$0xff]  ;;  %v559_v0 = vmov 0.0  }
   0x4   :  { %47 = vperm.xlu0 %514, %v37_v5   ;;  %57 = vperm.xlu1 %515, %v39_v6   ;;  %v520_v9 = vld [vmem:[%s701_s1 + $0x18] sm:$0xff]   ;;  %v41_v10 = vld [vmem:[%s702_s2 + $0x20] sm:$0xff]  ;;  %v43_v12 = vld [vmem:[%s702_s2 + $0x30] sm:$0xff] }
   0x5   :  { %v44_v13 = vld [vmem:[%s702_s2 + $0x38] sm:$0xff]  ;;  %v209_v14 = vld [vmem:[%s703_s4] sm:$0xff]  ;;  %v210_v15 = vld [vmem:[%s703_s4 + $0x8] sm:$0xff]  ;;  %499 = vmatprep.subr.bf16.mxu0 %v559_v0 }
   0x6   :  { %476 = vmatmul.mubr.msk.bf16.vlgmr.msra.gmra.mrb[0].mxu0 %vm111_vm0, %v518_v3  ;;  %v211_v16 = vld [vmem:[%s703_s4 + $0x10] sm:$0xff]  ;;  %v212_v17 = vld [vmem:[%s703_s4 + $0x18] sm:$0xff]  ;;  %v213_v18 = vld [vmem:[%s703_s4 + $0x20] sm:$0xff] }
   0x7   :  { %479 = vmatprep.mubr.msk.bf16.mxu0 %vm111_vm0, %v519_v4  ;;  %v214_v19 = vld [vmem:[%s703_s4 + $0x28] sm:$0xff]  ;;  %v215_v20 = vld [vmem:[%s703_s4 + $0x30] sm:$0xff]  ;;  %v216_v21 = vld [vmem:[%s703_s4 + $0x38] sm:$0xff] }
   0x8   :  { %52 = vperm.xlu0 %514, %v38_v7   ;;  %62 = vperm.xlu1 %515, %v40_v8   ;;  %v369_v22 = vld [vmem:[%s704_s6] sm:$0xff]  ;;  %v370_v23 = vld [vmem:[%s704_s6 + $0x8] sm:$0xff]  ;;  %v523_v62 = vld [vmem:[%s705_s3 + $0x10] sm:$0xff]  }
   0x9   :  { %v521_v24 = vld [vmem:[%s705_s3] sm:$0xff]   ;;  %v522_v61 = vld [vmem:[%s705_s3 + $0x8] sm:$0xff]   ;;  %v524_v63 = vld [vmem:[%s705_s3 + $0x18] sm:$0xff]  }
   0xa   :  { %491 = vmatprep.mubr.msk.bf16.mxu1 %vm277_vm1, %v521_v24 }
   0xc   :  { %67 = vperm.xlu0 %514, %v41_v10   ;;  %72 = vperm.xlu1 %515, %v42_v11  }
   0xe   :  { %480 = vmatmul.mubr.msk.bf16.gmra.mrb[4].mxu0 %vm111_vm0, %v520_v9 }
   0xf   :  { %507 = vmatprep.mubr.msk.bf16.mxu0 %vm560_vm2, %v559_v0 }
  0x10   :  { %77 = vperm.xlu0 %514, %v43_v12   ;;  %82 = vperm.xlu1 %515, %v44_v13  }
  0x14   :  { %219 = vperm.xlu0 %514, %v209_v14   ;;  %224 = vperm.xlu1 %515, %v210_v15  }
  0x18   :  { %229 = vperm.xlu0 %514, %v211_v16   ;;  %234 = vperm.xlu1 %515, %v212_v17  }
  0x1c   :  { %239 = vperm.xlu0 %514, %v213_v18   ;;  %244 = vperm.xlu1 %515, %v214_v19  }
  0x20   :  { %249 = vperm.xlu0 %514, %v215_v20   ;;  %254 = vperm.xlu1 %515, %v216_v21  }
  0x24   :  { %373 = vperm.xlu0 %514, %v369_v22   ;;  %378 = vperm.xlu1 %515, %v370_v23  }
  0x83   :  { %v48_v25 = vpop.permute.xlu0 %47  ;;  %v58_v26 = vpop.permute.xlu1 %57 }
  0x87   :  { %v53_v27 = vpop.permute.xlu0 %52  ;;  %v63_v28 = vpop.permute.xlu1 %62 }
  0x8b   :  { %v68_v32 = vpop.permute.xlu0 %67  ;;  %v73_v37 = vpop.permute.xlu1 %72 }
  0x8f   :  { %v78_v39 = vpop.permute.xlu0 %77  ;;  %v83_v43 = vpop.permute.xlu1 %82 }
  0x93   :  { %v220_v1 = vpop.permute.xlu0 %219  ;;  %v225_v2 = vpop.permute.xlu1 %224 }
  0x97   :  { %v230_v3 = vpop.permute.xlu0 %229  ;;  %v235_v4 = vpop.permute.xlu1 %234 }
  0x9b   :  { %v240_v8 = vpop.permute.xlu0 %239  ;;  %v245_v13 = vpop.permute.xlu1 %244 }
  0x9f   :  { %v250_v15 = vpop.permute.xlu0 %249  ;;  %v255_v19 = vpop.permute.xlu1 %254 }
  0xd9   :  { %v477_v29 = vpop.f32.mrb[0].mxu0 }
  0xda   :  { %v167_v30 = vadd.f32 %v477_v29, %v58_v26  ;;  %v158_v31 = vpop.f32.mrb[1].mxu0 }
  0xdb   :  { %v159_v33 = vadd.f32 %v158_v31, %v48_v25  ;;  %v478_v34 = vpop.f32.mrb[2].mxu0 }
  0xdc   :  { %526 = vtanh.f32 %v167_v30  ;;  %v170_v35 = vadd.f32 %v478_v34, %v63_v28  ;;  %v161_v36 = vpop.f32.mrb[3].mxu0 }
  0xdd   :  { %528 = vtanh.f32 %v159_v33  ;;  %v162_v38 = vadd.f32 %v161_v36, %v53_v27 }
  0xde   :  { %530 = vtanh.f32 %v170_v35 }
  0xdf   :  { %532 = vtanh.f32 %v162_v38  ;;  %v374_v38 = vpop.permute.xlu0 %373 }
  0xe1   :  { %v481_v40 = vpop.f32.mrb[4].mxu0 }
  0xe2   :  { %v183_v41 = vadd.f32 %v481_v40, %v78_v39  ;;  %v174_v42 = vpop.f32.mrb[5].mxu0 }
  0xe3   :  { %v175_v44 = vadd.f32 %v174_v42, %v68_v32  ;;  %v482_v45 = vpop.f32.mrb[6].mxu0  ;;  %v379_v42 = vpop.permute.xlu1 %378 }
  0xe4   :  { %534 = vtanh.f32 %v183_v41  ;;  %v186_v46 = vadd.f32 %v482_v45, %v83_v43  ;;  %v177_v47 = vpop.f32.mrb[7].mxu0 }
  0xe5   :  { %536 = vtanh.f32 %v175_v44  ;;  %v178_v48 = vadd.f32 %v177_v47, %v73_v37  ;;  %v525_v37 = vld [vmem:[%s706_s5] sm:$0xff]  }
  0xe6   :  { %v527_v49 = vpop.eup %526  ;;  %538 = vtanh.f32 %v186_v46 }
  0xe7   :  { %v529_v50 = vpop.eup %528  ;;  %540 = vtanh.f32 %v178_v48 }
  0xe8   :  { %v531_v51 = vpop.eup %530 }
  0xe9   :  { %v533_v52 = vpop.eup %532  ;;  %v206_v53 = vpack.c.bf16 %v531_v51, %v527_v49 }
  0xea   :  { %v205_v54 = vpack.c.bf16 %v533_v52, %v529_v50 }
  0xec   :  { %483 = vmatprep.subr.bf16.mxu1 %v205_v54 }
  0xed   :  { %484 = vmatpush3.bf16.msra.mxu1 %v205_v54 }
  0xee   :  { %v535_v55 = vpop.eup %534  ;;  %485 = vmatprep.subr.bf16.mxu1 %v206_v53 }
  0xef   :  { %v537_v56 = vpop.eup %536 }
  0xf0   :  { %v539_v57 = vpop.eup %538 }
  0xf1   :  { %v541_v58 = vpop.eup %540  ;;  %486 = vmatpush3.bf16.msra.mxu1 %v206_v53  ;;  %v208_v59 = vpack.c.bf16 %v539_v57, %v535_v55 }
  0xf2   :  { %v207_v60 = vpack.c.bf16 %v541_v58, %v537_v56 }
  0xf4   :  { %487 = vmatprep.subr.bf16.mxu1 %v207_v60 }
  0xf5   :  { %488 = vmatpush3.bf16.msra.mxu1 %v207_v60 }
  0xf6   :  { %489 = vmatprep.subr.bf16.mxu1 %v208_v59 }
  0xf9   :  { %490 = vmatpush3.bf16.msra.mxu1 %v208_v59 }
  0xfc   :  { %492 = vmatmul.mubr.msk.bf16.vlgmr.msra.gmra.mrb[0].mxu1 %vm277_vm1, %v522_v61 }
  0xfd   :  { %495 = vmatprep.mubr.msk.bf16.mxu1 %vm277_vm1, %v523_v62 }
 0x104   :  { %496 = vmatmul.mubr.msk.bf16.gmra.mrb[4].mxu1 %vm277_vm1, %v524_v63 }
 0x1cf   :  { %v493_v5 = vpop.f32.mrb[0].mxu1 }
 0x1d0   :  { %v333_v6 = vadd.f32 %v493_v5, %v230_v3  ;;  %v324_v7 = vpop.f32.mrb[1].mxu1 }
 0x1d1   :  { %v325_v9 = vadd.f32 %v324_v7, %v220_v1  ;;  %v494_v10 = vpop.f32.mrb[2].mxu1 }
 0x1d2   :  { %542 = vtanh.f32 %v333_v6  ;;  %v336_v11 = vadd.f32 %v494_v10, %v235_v4  ;;  %v327_v12 = vpop.f32.mrb[3].mxu1 }
 0x1d3   :  { %544 = vtanh.f32 %v325_v9  ;;  %v328_v14 = vadd.f32 %v327_v12, %v225_v2 }
 0x1d4   :  { %546 = vtanh.f32 %v336_v11 }
 0x1d5   :  { %548 = vtanh.f32 %v328_v14 }
 0x1d7   :  { %v497_v16 = vpop.f32.mrb[4].mxu1 }
 0x1d8   :  { %v349_v17 = vadd.f32 %v497_v16, %v250_v15  ;;  %v340_v18 = vpop.f32.mrb[5].mxu1 }
 0x1d9   :  { %v341_v20 = vadd.f32 %v340_v18, %v240_v8  ;;  %v498_v21 = vpop.f32.mrb[6].mxu1 }
 0x1da   :  { %550 = vtanh.f32 %v349_v17  ;;  %v352_v22 = vadd.f32 %v498_v21, %v255_v19  ;;  %v343_v23 = vpop.f32.mrb[7].mxu1 }
 0x1db   :  { %552 = vtanh.f32 %v341_v20  ;;  %v344_v24 = vadd.f32 %v343_v23, %v245_v13 }
 0x1dc   :  { %v543_v25 = vpop.eup %542  ;;  %554 = vtanh.f32 %v352_v22 }
 0x1dd   :  { %v545_v26 = vpop.eup %544  ;;  %556 = vtanh.f32 %v344_v24 }
 0x1de   :  { %v547_v27 = vpop.eup %546 }
 0x1df   :  { %v549_v28 = vpop.eup %548  ;;  %v366_v29 = vpack.c.bf16 %v547_v27, %v543_v25 }
 0x1e0   :  { %v365_v30 = vpack.c.bf16 %v549_v28, %v545_v26 }
 0x1e2   :  { %500 = vmatpush3.bf16.msra.mxu0 %v365_v30 }
 0x1e3   :  { %501 = vmatprep.subr.bf16.mxu0 %v559_v0 }
 0x1e4   :  { %v551_v31 = vpop.eup %550 }
 0x1e5   :  { %v553_v32 = vpop.eup %552 }
 0x1e6   :  { %v555_v33 = vpop.eup %554  ;;  %502 = vmatpush3.bf16.msra.mxu0 %v366_v29 }
 0x1e7   :  { %v557_v34 = vpop.eup %556  ;;  %503 = vmatprep.subr.bf16.mxu0 %v559_v0  ;;  %v368_v35 = vpack.c.bf16 %v555_v33, %v551_v31 }
 0x1e8   :  { %v367_v36 = vpack.c.bf16 %v557_v34, %v553_v32 }
 0x1ea   :  { %504 = vmatpush3.bf16.msra.mxu0 %v367_v36 }
 0x1eb   :  { %505 = vmatprep.subr.bf16.mxu0 %v559_v0 }
 0x1ee   :  { %506 = vmatpush3.bf16.msra.mxu0 %v368_v35 }
 0x1f1   :  { %508 = vmatmul.mubr.msk.bf16.vlgmr.msra.gmra.mrb[8].mxu0 %vm277_vm1, %v525_v37 }
 0x2c4   :  { %v423_v39 = vpop.f32.mrb[8].mxu0 }
 0x2c5   :  { %v424_v40 = vadd.f32 %v423_v39, %v374_v38  ;;  %v509_v41 = vpop.f32.mrb[9].mxu0 }
 0x2c6   :  { %v426_v43 = vpop.f32.mrb[10].mxu0 }
 0x2c7   :  { %430 = vst [vmem:[%s707_s7] sm:$0xff] %v424_v40  ;;  %v427_v44 = vadd.f32 %v426_v43, %v379_v42  ;;  %v510_v45 = vpop.f32.mrb[11].mxu0 }
 0x2c9   :  { %431 = vst [vmem:[%s707_s7 + $0x8] sm:$0xff] %v427_v44 }

</bundles_post_ra>
